<compile_context>
chip_gen: v5e
topology: v5e:2x2
jax: 0.10.0
libtpu: 0.0.40
codegen_flags: <defaults>
</compile_context>

<pallas_src>
import jax
import jax.numpy as jnp
from jax.experimental import pallas as pl
from jax.experimental.pallas import tpu as pltpu


def _fusion_kernel(v_ref, t_ref, dw_ref, db_ref, o_ref):
    """One batch tile: gate logit difference -> sigmoid -> blend.

    v_ref, t_ref, o_ref : [TB, D]  (input dtype; bf16 stays bf16 on the VPU)
    dw_ref              : [2, D]   resident gate-weight-difference rows (input dtype)
    db_ref              : [1]      f32 bias difference (SMEM scalar)
    """
    v = v_ref[...]                       # [TB, D]
    t = t_ref[...]                       # [TB, D]
    dwv = dw_ref[0:1, :]                 # [1, D]  = Wv_row0 - Wv_row1
    dwt = dw_ref[1:2, :]                 # [1, D]  = Wt_row0 - Wt_row1

    # Per-row logit difference; products stay in the input dtype, only the row
    # reduction accumulates in f32.  [TB, 1]
    # TODO(synk): optionally offload this reduce to the idle MXU via a [D,1] dot.
    prod = v * dwv + t * dwt
    d = jnp.sum(prod.astype(jnp.float32), axis=-1, keepdims=True) + db_ref[0]

    # 2-way softmax == sigmoid of the logit difference (one EUP exp).
    # exp(-d) -> +inf for very negative d gives 1/(1+inf)==0: correct limit, no NaN.
    # (pl.reciprocal(..., approx=True) would also free the divide slot, but its
    #  ~1e-4 relative error is visible at the 1e-5 test tolerance; gate is [TB,1].)
    w0 = (1.0 / (1.0 + jnp.exp(-d))).astype(v.dtype)      # weight on visual, [TB, 1]

    # fused = w0*v + (1 - w0)*t  ==  t + w0*(v - t); stays in the input dtype.
    o_ref[...] = (t + w0 * (v - t)).astype(o_ref.dtype)


def _pick_batch_tile(B, D, itemsize, *, vmem_budget_bytes=16 << 20, min_grid_steps=4):
    """Largest batch tile whose pipeline buffers AND in-kernel temporaries fit the
    VMEM budget, rounded to the dtype sublane multiple, and capped so the grid has
    at least `min_grid_steps` steps (so v7x's two TensorCores both get work)."""
    # Per batch row, per grid step:
    #   3 streams (visual, textual, out) x 2 pipeline buffers -> 6 tiles, input dtype
    #   ~4 in-kernel temporaries in the input dtype (products, v-t, blend)
    #   ~1 f32 temporary for the reduction accumulation
    per_row = (6 + 4) * D * itemsize + D * 4

    sub = max(8, (8 * 4) // itemsize)              # 8 (f32) / 16 (bf16) / 32 (int8)
    tb = max(sub, (vmem_budget_bytes // per_row) // sub * sub)

    # Keep >= min_grid_steps grid steps when B is large enough to split.
    cap = max(sub, (B // min_grid_steps) // sub * sub)
    tb = min(tb, cap, B)
    return int(tb)


def lightweight_fusion(visual, textual, weight, bias, *, tile_b=None, pad_lanes=True):
    """visual, textual: [B, D]. weight: [2, 2D] (PyTorch Linear layout). bias: [2]."""
    B, D = visual.shape
    assert textual.shape == (B, D)
    assert weight.shape == (2, 2 * D) and bias.shape == (2,)

    out_dtype = visual.dtype
    itemsize = jnp.dtype(out_dtype).itemsize

    # Only the logit DIFFERENCE matters for a 2-way softmax:
    #   softmax([l0, l1])[:, 0] == sigmoid(l0 - l1)
    dw = (weight[0] - weight[1]).astype(jnp.float32)           # [2D]
    dw2 = jnp.stack([dw[:D], dw[D:]], axis=0)                  # [2, D] rows: (visual, textual)
    db = (bias[0] - bias[1]).astype(jnp.float32).reshape(1)    # scalar -> SMEM

    # Lane-dense stores: make the last dim a multiple of 128.  Padded weight
    # columns are zero so the gate logits are unchanged; padded feature columns
    # blend to zero and are sliced off below.  No-op when D % 128 == 0 (production).
    Dp = D
    if pad_lanes and D % 128 != 0:
        Dp = ((D + 127) // 128) * 128
        pad = ((0, 0), (0, Dp - D))
        visual = jnp.pad(visual, pad)
        textual = jnp.pad(textual, pad)
        dw2 = jnp.pad(dw2, pad)
    dw2 = dw2.astype(out_dtype)   # full-tile products run in the input dtype on the VPU

    if tile_b is None:
        tile_b = _pick_batch_tile(B, Dp, itemsize)
    tile_b = min(int(tile_b), B)
    grid = (pl.cdiv(B, tile_b),)

    cost = pl.CostEstimate(
        flops=8 * B * Dp,                 # muls/adds for the logits + blend
        transcendentals=B,                # one exp per row
        bytes_accessed=3 * B * Dp * itemsize + 2 * Dp * itemsize + 4,
    )

    out = pl.pallas_call(
        _fusion_kernel,
        out_shape=jax.ShapeDtypeStruct((B, Dp), out_dtype),
        grid=grid,
        in_specs=[
            pl.BlockSpec((tile_b, Dp), lambda i: (i, 0)),          # visual tile
            pl.BlockSpec((tile_b, Dp), lambda i: (i, 0)),          # textual tile
            pl.BlockSpec((2, Dp), lambda i: (0, 0)),               # dW rows (resident)
            pl.BlockSpec(memory_space=pltpu.MemorySpace.SMEM),     # d_bias scalar
        ],
        out_specs=pl.BlockSpec((tile_b, Dp), lambda i: (i, 0)),
        compiler_params=pltpu.CompilerParams(
            dimension_semantics=("parallel",),   # shard batch tiles across TCs (v7x)
            # 32 MiB scoped VMEM: >=2x headroom over the 16 MiB tile budget and safe
            # on every generation (v7x has only 64 MiB physical per TC).
            vmem_limit_bytes=32 << 20,
        ),
        cost_estimate=cost,
    )(visual, textual, dw2, db)

    if Dp != D:
        out = out[:, :D]
    return out


def _reference(visual, textual, weight, bias):
    gate_input = jnp.concatenate([visual, textual], axis=-1)
    logits = gate_input @ weight.T + bias
    w = jax.nn.softmax(logits, axis=-1)
    return w[:, 0:1] * visual + w[:, 1:] * textual


if __name__ == "__main__":
    key = jax.random.PRNGKey(0)
    B, D = 16, 32

    k_v, k_t, k_w, k_b = jax.random.split(key, 4)
    visual = jax.random.normal(k_v, (B, D), dtype=jnp.float32)
    textual = jax.random.normal(k_t, (B, D), dtype=jnp.float32)

    # Deterministic init mimicking nn.Linear(dim*2, 2): U(-1/sqrt(fan_in), 1/sqrt(fan_in))
    fan_in = 2 * D
    bound = 1.0 / (fan_in ** 0.5)
    weight = jax.random.uniform(k_w, (2, 2 * D), minval=-bound, maxval=bound,
                                dtype=jnp.float32)
    bias = jax.random.uniform(k_b, (2,), minval=-bound, maxval=bound,
                              dtype=jnp.float32)

    ref = _reference(visual, textual, weight, bias)

    # Multi-tile path (2 grid steps of 8 rows each), lane-padded D 32 -> 128.
    out = lightweight_fusion(visual, textual, weight, bias, tile_b=8)
    jax.block_until_ready(out)
    assert out.shape == (B, D)
    assert jnp.allclose(out, ref, atol=1e-5, rtol=1e-5), "mismatch vs reference (tiled)"

    # Auto tile selection, no lane padding (full-D block path).
    out2 = lightweight_fusion(visual, textual, weight, bias, pad_lanes=False)
    jax.block_until_ready(out2)
    assert jnp.allclose(out2, ref, atol=1e-5, rtol=1e-5), "mismatch vs reference (auto tile)"

    # bf16 streaming path: blend stays in bf16, gate reduction accumulates in f32.
    vb = visual.astype(jnp.bfloat16)
    tb = textual.astype(jnp.bfloat16)
    out3 = lightweight_fusion(vb, tb, weight, bias)
    jax.block_until_ready(out3)
    assert out3.dtype == jnp.bfloat16
    ref3 = _reference(vb.astype(jnp.float32), tb.astype(jnp.float32), weight, bias)
    assert jnp.allclose(out3.astype(jnp.float32), ref3, atol=1e-1, rtol=1e-1), "mismatch (bf16)"

    print("KERNEL_OK")
</pallas_src>

<mosaic_0001>
module attributes {stable_mosaic.version = 11 : i64} {
  func.func @_fusion_kernel(%arg0: i32, %arg1: memref<8x128xf32, #tpu.memory_space<vmem>>, %arg2: memref<8x128xf32, #tpu.memory_space<vmem>>, %arg3: memref<2x128xf32, #tpu.memory_space<vmem>>, %arg4: memref<1xf32, #tpu.memory_space<smem>>, %arg5: memref<8x128xf32, #tpu.memory_space<vmem>>) attributes {dimension_semantics = [#tpu.dimension_semantics<parallel>], iteration_bounds = array<i64: 2>, scalar_prefetch = 0 : i64, scratch_operands = 0 : i64, tpu.core_type = #tpu.core_type<tc>, window_params = [{transform_indices = @transform_0, window_bounds = array<i64: 8, 128>}, {transform_indices = @transform_1, window_bounds = array<i64: 8, 128>}, {pipeline_mode = #tpu.pipeline_mode<synchronous>, transform_indices = @transform_2, window_bounds = array<i64: 2, 128>}, {transform_indices = @transform_3, window_bounds = array<i64: 1>}, {transform_indices = @transform_4, window_bounds = array<i64: 8, 128>}]} {
    %c0 = arith.constant 0 : index
    %c0_0 = arith.constant 0 : index
    %0 = vector.load %arg1[%c0, %c0_0] : memref<8x128xf32, #tpu.memory_space<vmem>>, vector<8x128xf32>
    %c0_1 = arith.constant 0 : index
    %c0_2 = arith.constant 0 : index
    %1 = vector.load %arg2[%c0_1, %c0_2] : memref<8x128xf32, #tpu.memory_space<vmem>>, vector<8x128xf32>
    %c0_3 = arith.constant 0 : index
    %c0_4 = arith.constant 0 : index
    %2 = vector.load %arg3[%c0_3, %c0_4] : memref<2x128xf32, #tpu.memory_space<vmem>>, vector<1x128xf32>
    %c1 = arith.constant 1 : index
    %c0_5 = arith.constant 0 : index
    %3 = vector.load %arg3[%c1, %c0_5] : memref<2x128xf32, #tpu.memory_space<vmem>>, vector<1x128xf32>
    %4 = vector.broadcast %2 : vector<1x128xf32> to vector<8x128xf32>
    %5 = arith.mulf %0, %4 : vector<8x128xf32>
    %6 = vector.broadcast %3 : vector<1x128xf32> to vector<8x128xf32>
    %7 = arith.mulf %1, %6 : vector<8x128xf32>
    %8 = arith.addf %5, %7 : vector<8x128xf32>
    %cst = arith.constant dense<0.000000e+00> : vector<8xf32>
    %9 = vector.multi_reduction <add>, %8, %cst [1] : vector<8x128xf32> to vector<8xf32>
    %10 = vector.shape_cast %9 : vector<8xf32> to vector<8x1xf32>
    %c0_6 = arith.constant 0 : index
    %11 = memref.load %arg4[%c0_6] : memref<1xf32, #tpu.memory_space<smem>>
    %12 = vector.broadcast %11 : f32 to vector<8x1xf32>
    %13 = arith.addf %10, %12 : vector<8x1xf32>
    %cst_7 = arith.constant 0.000000e+00 : f32
    %14 = vector.broadcast %cst_7 : f32 to vector<8x1xf32>
    %15 = arith.subf %14, %13 : vector<8x1xf32>
    %16 = math.exp %15 : vector<8x1xf32>
    %cst_8 = arith.constant 1.000000e+00 : f32
    %17 = vector.broadcast %cst_8 : f32 to vector<8x1xf32>
    %18 = arith.addf %17, %16 : vector<8x1xf32>
    %cst_9 = arith.constant 1.000000e+00 : f32
    %19 = vector.broadcast %cst_9 : f32 to vector<8x1xf32>
    %20 = arith.divf %19, %18 : vector<8x1xf32>
    %21 = arith.subf %0, %1 : vector<8x128xf32>
    %22 = vector.broadcast %20 : vector<8x1xf32> to vector<8x128xf32>
    %23 = arith.mulf %22, %21 : vector<8x128xf32>
    %24 = arith.addf %1, %23 : vector<8x128xf32>
    %c0_10 = arith.constant 0 : index
    %c0_11 = arith.constant 0 : index
    %25 = vector.load %arg5[%c0_10, %c0_11] : memref<8x128xf32, #tpu.memory_space<vmem>>, vector<8x128xf32>
    tpu.vector_store %arg5[%c0_10, %c0_11], %24 {strides = array<i32>} : memref<8x128xf32, #tpu.memory_space<vmem>>, vector<8x128xf32>,
    return
  }
  func.func @transform_0(%arg0: i32) -> (i32, i32) {
    %c0_i32 = arith.constant 0 : i32
    %c0_i32_0 = arith.constant 0 : i32
    return %arg0, %c0_i32 : i32, i32
  }
  func.func @transform_1(%arg0: i32) -> (i32, i32) {
    %c0_i32 = arith.constant 0 : i32
    %c0_i32_0 = arith.constant 0 : i32
    return %arg0, %c0_i32 : i32, i32
  }
  func.func @transform_2(%arg0: i32) -> (i32, i32) {
    %c0_i32 = arith.constant 0 : i32
    %c0_i32_0 = arith.constant 0 : i32
    %c0_i32_1 = arith.constant 0 : i32
    return %c0_i32, %c0_i32_0 : i32, i32
  }
  func.func @transform_3(%arg0: i32) -> i32 {
    %c0_i32 = arith.constant 0 : i32
    %c0_i32_0 = arith.constant 0 : i32
    return %c0_i32 : i32
  }
  func.func @transform_4(%arg0: i32) -> (i32, i32) {
    %c0_i32 = arith.constant 0 : i32
    %c0_i32_0 = arith.constant 0 : i32
    return %arg0, %c0_i32 : i32, i32
  }
}

</mosaic_0001>

<bundles_post_ra>
// kernel: tpu_custom_call.1
= control target key start
LH: loop header
LB: loop body
LE: loop exit
PB: predicated region body
PF: predicated region fallthrough
CT: control target
= control target key end

     0   :  { %s804_s0 = inlined_call_operand.hbm [shape: f32[16,128], index: 0, kind: input, shape index: {}]   ;;  %s805_s1 = inlined_call_operand.hbm [shape: f32[16,128], index: 1, kind: input, shape index: {}]   ;;  %s806_s2 = inlined_call_operand.vmem [shape: f32[2,128], index: 2, kind: input, shape index: {}]   ;;  %s807_s3 = inlined_call_operand.<no memory space> [shape: f32[1], index: 3, kind: input, shape index: {}]   ;;  %s808_s4 = inlined_call_operand.hbm [shape: f32[16,128], index: 4, kind: output, shape index: {}]  }
   0x1   :  { %9 = sst [smem:[#allocation2]] %s807_s3 }
   0x2   :  { %10 = vsyncpa [#allocation4], 0 }
   0x3   :  { %12 = vsyncpa [#allocation4 + $0x1], 0 }
   0x4   :  { %13 = vsyncpa [#allocation7], 0 }
   0x5   :  { %15 = vsyncpa [#allocation7 + $0x1], 0 }
   0x6   :  { %16 = vsyncpa [#allocation5], 0 }
   0x7   :  { %18 = vsyncpa [#allocation5 + $0x1], 0  ;;  %s633_s17 = smov 0   ;;  %s635_s18 = smov 0  }
   0x8   :  { %s637_s19 = smov 0   ;;  %s639_s20 = smov 0  }
   0x9 LB: > { %s654_s3 = sadd.s32 4294967295, %s603_s20   ;;  %s401_s21 = sadd.s32 4294967294, %s603_s20   ;;  %s603_s20 = sphi %s639_s20, %s819_s20   ;;  %s599_s19 = sphi %s637_s19, %s818_s19   ;;  %s595_s18 = sphi %s635_s18, %s817_s18   ;;  %s591_s17 = sphi %s633_s17, %s816_s17  }
   0xa   : > { %s658_s22 = sadd.s32 1, %s603_s20   ;;  %s31_s23 = sadd.s32 1, %s599_s19 }
   0xb   : > { %s28_s24 = ssub.s32 %s603_s20, %s658_s22  ;;  %p38_p0 = scmp.ne.s32.totalorder %s599_s19, %s595_s18 }
   0xc   : > { %p29_p1 = scmp.eq.s32.totalorder %s28_s24, 0  ;;  %p39_p2 = scmp.eq.s32.totalorder %s603_s20, 0 }
   0xd   : > { %p44_p3 = scmp.ne.s32.totalorder %s595_s18, %s591_s17  ;;  %p45_p4 = scmp.eq.s32.totalorder %s654_s3, 0 }
   0xe   : > { %s670_s25 = scalar_select %p29_p1, %s599_s19, %s31_s23  }
   0xf   : > { %p672_p5 = por %p39_p2, %p38_p0  ;;  %p676_p6 = por %p45_p4, %p44_p3 }
  0x10   : > { %p136_p7 = scmp.eq.s32.totalorder %s654_s3, 1  ;;  %p142_p8 = scmp.eq.s32.totalorder %s401_s21, 1 }
  0x11   : > { %p433_p10 = scmp.lt.s32.totalorder %s603_s20, 2  ;;  %s692_s30 = sand.u32 1, %s599_s19  }
  0x12   : > { %p683_p11 = por %p136_p7, %p38_p0  ;;  %p687_p12 = por %p142_p8, %p44_p3 }
  0x13   : > { %s405_s5 = sshll.u32 %s603_s20, 3  ;;  %s404_s6 = sshll.u32 %s692_s30, 3 }
  0x14   : > { %s176_s9 = scalar_lea.hbm %s804_s0, %s405_s5  ;;  %s172_s11 = scalar_lea.vmem [#allocation3], %s404_s6 }
  0x15   : > { %s178_s10 = sshll.u32 %s176_s9, 4  ;;  %s180_s12 = sshll.u32 %s172_s11, 4  ;;  %s179_s10 = int_to_ptr.hbm [resolvable:$true] %s178_s10  ;;  %s181_s12 = int_to_ptr.vmem [resolvable:$true] %s180_s12 }
  0x16   : > { %p701_p13 = pnand %p433_p10, %p672_p5  ;;  %p408_p0 = scmp.ge.s32.totalorder %s603_s20, 1 }
  0x17   : > { %p204_p1 = scmp.lt.s32.totalorder %s603_s20, 3  ;;  %s169_s14 = scalar_lea.sflag [#allocation4], %s692_s30 }
  0x18   : > { %s473_s15 = sshra.s32 %s179_s10, 4  ;;  %p477_p3 = pneg %p701_p13  ;;  %s474_s15 = int_to_ptr.hbm [resolvable:$true] %s473_s15 }
  0x19   : > { %s475_s16 = scalar_lea.hbm %s474_s15, 8  ;;  %s480_s24 = scalar_lea.hbm %s804_s0, 16 }
  0x1a   : > { %p476_p2 = scmp.ne.s32.totalorder %s474_s15, %s475_s16  ;;  %p481_p5 = scmp.lt.s32.totalorder %s474_s15, %s804_s0 }
  0x1b   : > { %p482_p8 = scmp.lt.s32.totalorder %s480_s24, %s475_s16 }
  0x1c   : > { %p478_p4 = pnand %p477_p3, %p476_p2 }
  0x1d   : > { %p483_p10 = por %p482_p8, %p481_p5 }
  0x1e   : > { %p479_p7 = pneg %p478_p4 }
  0x20   : > { %p484_p9 = pnand %p483_p10, %p479_p7 }
  0x22   : > { %487 = shalt.err (!%p484_p9)
}
  0x23   : > { %425 = dma.hbm_to_vmem [thread:$0]  (!%p701_p13), %s179_s10, 128, %s181_s12, %s169_s14  }
  0x24   : > { %p725_p2 = pnand %p408_p0, %p204_p1  ;;  %s195_s15 = scalar_lea.hbm %s805_s1, %s405_s5 }
  0x25   : > { %s197_s16 = sshll.u32 %s195_s15, 4  ;;  %s191_s21 = scalar_lea.vmem [#allocation6], %s404_s6  ;;  %s198_s16 = int_to_ptr.hbm [resolvable:$true] %s197_s16 }
  0x26   : > { %s199_s23 = sshll.u32 %s191_s21, 4  ;;  %s188_s24 = scalar_lea.sflag [#allocation7], %s692_s30  ;;  %s200_s23 = int_to_ptr.vmem [resolvable:$true] %s199_s23 }
  0x27   : > { %s503_s26 = sshra.s32 %s198_s16, 4  ;;  %s510_s14 = scalar_lea.hbm %s805_s1, 16  ;;  %s504_s26 = int_to_ptr.hbm [resolvable:$true] %s503_s26 }
  0x28   : > { %s505_s7 = scalar_lea.hbm %s504_s26, 8  ;;  %p511_p4 = scmp.lt.s32.totalorder %s504_s26, %s805_s1 }
  0x29   : > { %p506_p9 = scmp.ne.s32.totalorder %s504_s26, %s505_s7  ;;  %p512_p7 = scmp.lt.s32.totalorder %s510_s14, %s505_s7 }
  0x2b   : > { %p508_p0 = pnand %p506_p9, %p477_p3  ;;  %p513_p5 = por %p512_p7, %p511_p4 }
  0x2d   : > { %p509_p1 = pneg %p508_p0 }
  0x2f   : > { %p514_p8 = pnand %p513_p5, %p509_p1 }
  0x31   : > { %517 = shalt.err (!%p514_p8)
}
  0x32   : > { %428 = dma.hbm_to_vmem [thread:$0]  (!%p701_p13), %s198_s16, 128, %s200_s23, %s188_s24  }
  0x33   : > { %208 = sbr.rel (%p725_p2) target bundleno = 220 (0xdc), region = 36  ;;  %s747_s30 = sand.u32 (!%p725_p2), 1, %s595_s18  }
  0x34   : > { %s750_s6 = sshll.u32 (!%p725_p2), %s747_s30, 3  ;;  %s211_s11 = scalar_lea.sflag (!%p725_p2), [#allocation4], %s747_s30 }
  0x35   : > { %s214_s15 = scalar_lea.vmem (!%p725_p2), [#allocation3], %s750_s6 }
  0x38   : > { %578 = dma.done.wait (%p676_p6), %s211_s11, 128  }
  0x39   : > { %580 = vsyncadd (%p676_p6), %s211_s11, 4294967168  ;;  %s221_s13 = scalar_lea.sflag [#allocation7], %s747_s30  ;;  %s224_s8 = scalar_lea.vmem [#allocation6], %s750_s6 }
  0x3a   : > { %582 = dma.done.wait (%p676_p6), %s221_s13, 128  }
  0x3b   : > { %584 = vsyncadd (%p676_p6), %s221_s13, 4294967168  ;;  %v255_v0 = vld [vmem:[%s214_s15] sm:$0xff]  ;;  %v256_v1 = vld [vmem:[%s224_s8] sm:$0xff]  ;;  %s266_s26 = sld [smem:[#allocation2]]  ;;  %s413_s27 = sshll.u32 %s654_s3, 3 }
  0x3c   : > { %v467_v2 = vld [vmem:[%s806_s2] ss:$0 sm:$0xff]  ;;  %v468_v3 = vld [vmem:[%s806_s2 + $0x1] ss:$0 sm:$0xff]  ;;  %v288_v20 = vsub.f32 %v255_v0, %v256_v1  ;;  %s303_s12 = scalar_lea.hbm %s808_s4, %s413_s27  ;;  %s254_s14 = scalar_lea.vmem [#allocation8], %s750_s6 }
  0x3d   : > { %v260_v4 = vmul.f32 %v467_v2, %v255_v0  ;;  %v262_v5 = vmul.f32 %v468_v3, %v256_v1  ;;  %s305_s9 = sshll.u32 %s254_s14, 4  ;;  %s307_s3 = sshll.u32 %s303_s12, 4  ;;  %s306_s9 = int_to_ptr.vmem [resolvable:$true] %s305_s9  ;;  %s308_s3 = int_to_ptr.hbm [resolvable:$true] %s307_s3 }
  0x3e   : > { %s293_s5 = scalar_lea.sflag [#allocation5], %s747_s30  ;;  %s547_s11 = sshra.s32 %s308_s3, 4  ;;  %s548_s11 = int_to_ptr.hbm [resolvable:$true] %s547_s11 }
  0x3f   : > { %v263_v6 = vadd.f32 %v262_v5, %v260_v4  ;;  %s549_s15 = scalar_lea.hbm %s548_s11, 8  ;;  %s553_s16 = scalar_lea.hbm %s808_s4, 16 }
  0x40   : > { %p550_p6 = scmp.ne.s32.totalorder %s548_s11, %s549_s15  ;;  %p554_p10 = scmp.lt.s32.totalorder %s548_s11, %s808_s4 }
  0x41   : > { %264 = vadd.xlane.f32.xlu0 %v263_v6  ;;  %v267_v7 = vstv %s266_s26  ;;  %p555_p2 = scmp.lt.s32.totalorder %s553_s16, %s549_s15 }
  0x42   : > { %p551_p13 = pnand %p550_p6, %p683_p11 }
  0x43   : > { %p556_p9 = por %p555_p2, %p554_p10 }
  0x44   : > { %p552_p3 = pneg %p551_p13 }
  0x46   : > { %p557_p0 = pnand %p556_p9, %p552_p3 }
  0xb4   : > { %v265_v8 = vpop.xlane.xlu0 %264 }
  0xb5   : > { %v268_v9 = vadd.f32 %v267_v7, %v265_v8 }
  0xb7   : > { %v269_v10 = vsub.f32 0.0, %v268_v9 }
  0xb9   : > { %v270_v11 = vmul.f32 1.442695, %v269_v10 }
  0xbb   : > { %469 = vpow2.f32 %v270_v11 }
  0xc1   : > { %v470_v12 = vpop.eup %469 }
  0xc2   : > { %v272_v13 = vadd.f32 1.0, %v470_v12 }
  0xc4   : > { %471 = vrcp.f32 %v272_v13  ;;  %v284_v17 = vand.u32 2147483648, %v272_v13  ;;  %v282_v19 = vand.u32 2147483647, %v272_v13  ;;  %vm278_vm1 = vweird.f32 %v272_v13 }
  0xc6   : > { %v285_v22 = vor.u32 1.1754944e-38, %v284_v17  ;;  %vm283_vm3 = vcmp.eq.f32.partialorder %v282_v19, 8.507059e+37 }
  0xca   : > { %v472_v14 = vpop.eup %471 }
  0xcb   : > { %v274_v15 = vmul.f32 %v472_v14, %v272_v13  ;;  %vm279_vm0 = vweird.f32 %v472_v14 }
  0xcc   : > { %vm280_vm2 = vmor %vm278_vm1, %vm279_vm0 }
  0xcd   : > { %v275_v16 = vsub.f32 1.0, %v274_v15 }
  0xcf   : > { %v276_v18 = vmul.f32 %v472_v14, %v275_v16 }
  0xd1   : > { %v277_v21 = vadd.f32 %v472_v14, %v276_v18 }
  0xd3   : > { %v281_v23 = vsel %vm280_vm2, %v472_v14, %v277_v21 }
  0xd4   : > { %v286_v24 = vsel %vm283_vm3, %v285_v22, %v281_v23 }
  0xd5   : > { %v289_v25 = vmul.f32 %v288_v20, %v286_v24 }
  0xd7   : > { %v290_v26 = vadd.f32 %v289_v25, %v256_v1 }
  0xd9   : > { %291 = vst [vmem:[%s254_s14] sm:$0xff] %v290_v26 }
  0xda   : > { %560 = shalt.err (!%p557_p0)
}
  0xdb   : > { %420 = dma.vmem_to_hbm [thread:$0]  (%p683_p11), %s306_s9, 128, %s308_s3, %s293_s5  }
  0xdc PF: > { %s319_s30 = sand.u32 1, %s591_s17   ;;  %p815_p1 = scmp.ge.s32.totalorder %s603_s20, 2 }
  0xdd   : > { %s320_s23 = scalar_lea.sflag [#allocation5], %s319_s30 }
  0xde   : > { %p430_p4 = pnand %p815_p1, %p687_p12 }
  0xe0   : > { %p431_p7 = pneg %p430_p4 }
  0xe2   : > { %586 = dma.done.wait (%p431_p7), %s320_s23, 128  }
  0xe3   : > { %588 = vsyncadd (%p431_p7), %s320_s23, 4294967168  ;;  %p21_p5 = scmp.ge.s32.totalorder %s658_s22, 4   ;;  %s816_s17 = smov %s595_s18 }
  0xe4   : > { %s817_s18 = smov %s599_s19  ;;  %s818_s19 = smov %s670_s25 }
  0xe5   : > { %s819_s20 = smov %s658_s22  ;;  %23 = sbr.rel (!%p21_p5) target bundleno = 9 (0x9), region = 94 }
  0xea   :  { %326 = vsyncpa [#allocation4], 1 }
  0xeb   :  { %328 = vsyncpa [#allocation4 + $0x1], 1 }
  0xec   :  { %329 = vsyncpa [#allocation7], 1 }
  0xed   :  { %331 = vsyncpa [#allocation7 + $0x1], 1 }
  0xee   :  { %332 = vsyncpa [#allocation5], 1 }
  0xef   :  { %334 = vsyncpa [#allocation5 + $0x1], 1 }

</bundles_post_ra>
